<compile_context>
chip_gen: v6e
topology: v6e:2x2x1
jax: 0.10.0
libtpu: 0.0.40
codegen_flags: <defaults>
</compile_context>

<pallas_src>
import functools

import jax
import jax.numpy as jnp
from jax.experimental import pallas as pl
from jax.experimental.pallas import tpu as pltpu


def _temporal_conv_kernel(x_ref, w_ref, b_ref, o_ref, *, Kt, V, c_out, act_func):
    # x_ref : (Bt, c_in, T*V)       NCHW slab, spatial flattened (lanes = T*V)
    # w_ref : (out_ch, Kt*c_in)     taps stacked along contraction dim,
    #                               align residual already folded in
    # b_ref : (out_ch, 1)           conv (+align) bias, f32
    # o_ref : (Bt, c_out, T_out*V)  output slab (lanes = T_out*V)
    Bt = o_ref.shape[0]
    ToV = o_ref.shape[-1]
    gated = act_func in ("glu", "gtu")

    w = w_ref[...]                                        # (out_ch, Kt*c_in)
    # hoisted broadcast (JAX does not CSE broadcast_in_dim inside loops)
    bias = jnp.broadcast_to(b_ref[...].astype(jnp.float32), (w.shape[0], ToV))

    for b in range(Bt):                                   # Bt small & static
        xb = x_ref[b]                                      # (c_in, T*V)
        if Kt > 1:
            # Stack the Kt time-shifted views along the contraction dim so the
            # whole causal conv (+ folded align residual) is a single matmul.
            xs = jnp.concatenate(
                [xb[:, k * V:k * V + ToV] for k in range(Kt)], axis=0)
        else:
            xs = xb[:, :ToV]
        acc = jnp.dot(w, xs, preferred_element_type=jnp.float32) + bias

        if gated:
            x_p = acc[:c_out]                              # residual already in
            x_q = acc[c_out:]
            if act_func == "gtu":
                x_p = jnp.tanh(x_p)
            out = x_p * jax.nn.sigmoid(x_q)
        elif act_func == "relu":
            out = jnp.maximum(acc, 0.0)
        else:  # silu
            out = acc * jax.nn.sigmoid(acc)

        o_ref[b] = out.astype(o_ref.dtype)


def _choose_batch_tile(B, per_batch_bytes, vmem_budget_bytes=8 * 1024 * 1024):
    """Largest divisor of B whose double-buffered in+out block fits the budget,
    keeping >= 2 grid steps when B >= 2 (megacore sharding on v7x)."""
    bt = max(1, vmem_budget_bytes // max(1, 2 * per_batch_bytes))
    if B >= 2:
        bt = min(bt, (B + 1) // 2)
    bt = min(bt, B)
    for d in range(bt, 0, -1):
        if B % d == 0:
            return d
    return 1


def temporal_conv_layer(x_nchw, weight_oihw, bias, Kt, c_in, c_out, act_func,
                        align_weight=None, align_bias=None):
    """Forward of TemporalConvLayer.

    x_nchw       : (B, c_in, T, V)
    weight_oihw  : (out_ch, c_in, Kt, 1) with out_ch = 2*c_out (glu/gtu) or c_out
    bias         : (out_ch,)
    align_weight : (c_out, c_in, 1, 1), only needed when c_in > c_out
    align_bias   : (c_out,),           only needed when c_in > c_out
    returns      : (B, c_out, T-Kt+1, V)
    """
    assert act_func in ("glu", "gtu", "relu", "silu")
    B, cin_, T, V = x_nchw.shape
    assert cin_ == c_in
    gated = act_func in ("glu", "gtu")
    out_ch = 2 * c_out if gated else c_out
    assert weight_oihw.shape == (out_ch, c_in, Kt, 1)
    T_out = T - Kt + 1
    ToV = T_out * V

    # --- wrapper-side (tiny) weight prep; no HBM transposes of x -------------
    # W2[o, k*c_in + c] = weight[o, c, k, 0]
    w2 = jnp.transpose(weight_oihw[..., 0], (0, 2, 1)).reshape(out_ch, Kt * c_in)
    b2 = bias.astype(jnp.float32)

    # Fold the Align residual into tap Kt-1 of the first c_out output rows.
    if c_in < c_out:        # zero-pad align -> identity on the first c_in rows
        res = jnp.concatenate(
            [jnp.eye(c_in, dtype=w2.dtype),
             jnp.zeros((c_out - c_in, c_in), w2.dtype)], axis=0)
        res_b = jnp.zeros((c_out,), jnp.float32)
    elif c_in > c_out:      # 1x1 align conv -> fold its weight and bias
        assert align_weight is not None and align_bias is not None
        res = align_weight[:, :, 0, 0].astype(w2.dtype)
        res_b = align_bias.astype(jnp.float32)
    else:                   # identity align
        res = jnp.eye(c_in, dtype=w2.dtype)
        res_b = jnp.zeros((c_out,), jnp.float32)
    w2 = w2.at[:c_out, (Kt - 1) * c_in:Kt * c_in].add(res)
    b2 = b2.at[:c_out].add(res_b)
    w2 = w2.astype(x_nchw.dtype)
    b2 = b2.reshape(out_ch, 1)

    # Pure reshape of NCHW (free): (B, c_in, T*V)
    x2 = x_nchw.reshape(B, c_in, T * V)

    itemsize = jnp.dtype(x_nchw.dtype).itemsize
    per_batch_bytes = (c_in * T * V + c_out * ToV) * itemsize
    Bt = _choose_batch_tile(B, per_batch_bytes)

    trans_per_elem = {"glu": 1, "gtu": 2, "relu": 0, "silu": 1}[act_func]
    cost = pl.CostEstimate(
        flops=2 * B * (Kt * c_in) * out_ch * ToV,
        transcendentals=trans_per_elem * B * c_out * ToV,
        bytes_accessed=(x2.size * itemsize
                        + w2.size * jnp.dtype(w2.dtype).itemsize
                        + b2.size * 4
                        + B * c_out * ToV * itemsize),
    )

    kernel = functools.partial(_temporal_conv_kernel,
                               Kt=Kt, V=V, c_out=c_out, act_func=act_func)

    out = pl.pallas_call(
        kernel,
        out_shape=jax.ShapeDtypeStruct((B, c_out, ToV), x_nchw.dtype),
        grid_spec=pltpu.PrefetchScalarGridSpec(
            num_scalar_prefetch=0,
            grid=(B // Bt,),
            in_specs=[
                pl.BlockSpec((Bt, c_in, T * V), lambda i: (i, 0, 0)),
                pl.BlockSpec((out_ch, Kt * c_in), lambda i: (0, 0)),
                pl.BlockSpec((out_ch, 1), lambda i: (0, 0)),
            ],
            out_specs=pl.BlockSpec((Bt, c_out, ToV), lambda i: (i, 0, 0)),
        ),
        compiler_params=pltpu.CompilerParams(
            dimension_semantics=("parallel",)),
        cost_estimate=cost,
    )(x2, w2, b2)

    # Free reshape back to NCHW: (B, c_out, T_out, V)
    return out.reshape(B, c_out, T_out, V)


def _reference_forward(x, weight, bias, align_w, align_b, Kt, c_in, c_out, act_func):
    """Pure-JAX reference mirroring the PyTorch TemporalConvLayer.forward."""
    B, _, T, V = x.shape
    conv = jax.lax.conv_general_dilated(
        x, weight, window_strides=(1, 1), padding="VALID",
        dimension_numbers=("NCHW", "OIHW", "NCHW"))
    conv = conv + bias[None, :, None, None]
    if c_in > c_out:
        x_in = jax.lax.conv_general_dilated(
            x, align_w, window_strides=(1, 1), padding="VALID",
            dimension_numbers=("NCHW", "OIHW", "NCHW"))
        x_in = x_in + align_b[None, :, None, None]
    elif c_in < c_out:
        x_in = jnp.concatenate(
            [x, jnp.zeros((B, c_out - c_in, T, V), x.dtype)], axis=1)
    else:
        x_in = x
    x_in = x_in[:, :, Kt - 1:, :]
    if act_func in ("glu", "gtu"):
        x_p = conv[:, :c_out]
        x_q = conv[:, c_out:]
        if act_func == "glu":
            return (x_p + x_in) * jax.nn.sigmoid(x_q)
        return jnp.tanh(x_p + x_in) * jax.nn.sigmoid(x_q)
    if act_func == "relu":
        return jax.nn.relu(conv + x_in)
    return jax.nn.silu(conv + x_in)


if __name__ == "__main__":
    key = jax.random.PRNGKey(0)

    def make_params(k, out_ch, cin, kt):
        # PyTorch Conv2d init: U(-1/sqrt(fan_in), 1/sqrt(fan_in)), fan_in = cin*kt*1
        bound = 1.0 / float(cin * kt) ** 0.5
        kw, kb = jax.random.split(k)
        w = jax.random.uniform(kw, (out_ch, cin, kt, 1),
                               minval=-bound, maxval=bound, dtype=jnp.float32)
        b = jax.random.uniform(kb, (out_ch,),
                               minval=-bound, maxval=bound, dtype=jnp.float32)
        return w, b

    B, Kt, T, V = 2, 3, 12, 16   # n_vertex = 16, timesteps = 12
    configs = [
        ("glu",  4, 8),   # c_in <  c_out : zero-pad align folded as identity
        ("gtu",  8, 4),   # c_in >  c_out : 1x1 align conv folded into weight
        ("relu", 8, 8),   # c_in == c_out : identity align
        ("silu", 4, 8),   # ungated, zero-pad align
    ]

    for idx, (act, c_in, c_out) in enumerate(configs):
        k = jax.random.fold_in(key, idx)
        kx, kc, ka = jax.random.split(k, 3)
        x = jax.random.normal(kx, (B, c_in, T, V), dtype=jnp.float32)
        out_ch = 2 * c_out if act in ("glu", "gtu") else c_out
        w, b = make_params(kc, out_ch, c_in, Kt)
        if c_in > c_out:
            aw, ab = make_params(ka, c_out, c_in, 1)
        else:
            aw, ab = None, None

        out = temporal_conv_layer(x, w, b, Kt, c_in, c_out, act, aw, ab)
        out = jax.block_until_ready(out)

        ref = _reference_forward(x, w, b, aw, ab, Kt, c_in, c_out, act)
        assert out.shape == (B, c_out, T - Kt + 1, V)
        assert jnp.allclose(out, ref, atol=1e-4, rtol=1e-4), f"mismatch: {act}"

    print("KERNEL_OK")
</pallas_src>

<mosaic_0001>
module attributes {stable_mosaic.version = 11 : i64} {
  func.func @_temporal_conv_kernel(%arg0: i32, %arg1: memref<1x4x192xf32, #tpu.memory_space<vmem>>, %arg2: memref<16x12xf32, #tpu.memory_space<vmem>>, %arg3: memref<16x1xf32, #tpu.memory_space<vmem>>, %arg4: memref<1x8x160xf32, #tpu.memory_space<vmem>>) attributes {dimension_semantics = [#tpu.dimension_semantics<parallel>], iteration_bounds = array<i64: 2>, scalar_prefetch = 0 : i64, scratch_operands = 0 : i64, tpu.core_type = #tpu.core_type<tc>, window_params = [{transform_indices = @transform_0, window_bounds = array<i64: 1, 4, 192>}, {pipeline_mode = #tpu.pipeline_mode<synchronous>, transform_indices = @transform_1, window_bounds = array<i64: 16, 12>}, {pipeline_mode = #tpu.pipeline_mode<synchronous>, transform_indices = @transform_2, window_bounds = array<i64: 16, 1>}, {transform_indices = @transform_3, window_bounds = array<i64: 1, 8, 160>}]} {
    %c0 = arith.constant 0 : index
    %c0_0 = arith.constant 0 : index
    %0 = vector.load %arg2[%c0, %c0_0] : memref<16x12xf32, #tpu.memory_space<vmem>>, vector<16x12xf32>
    %c0_1 = arith.constant 0 : index
    %c0_2 = arith.constant 0 : index
    %1 = vector.load %arg3[%c0_1, %c0_2] : memref<16x1xf32, #tpu.memory_space<vmem>>, vector<16x1xf32>
    %2 = vector.shape_cast %1 : vector<16x1xf32> to vector<16x1xf32>
    %3 = vector.broadcast %2 : vector<16x1xf32> to vector<16x160xf32>
    %c0_3 = arith.constant 0 : index
    %c0_4 = arith.constant 0 : index
    %c0_5 = arith.constant 0 : index
    %4 = vector.load %arg1[%c0_3, %c0_4, %c0_5] : memref<1x4x192xf32, #tpu.memory_space<vmem>>, vector<1x4x192xf32>
    %5 = vector.shape_cast %4 : vector<1x4x192xf32> to vector<4x192xf32>
    %6 = vector.extract_strided_slice %5 {offsets = [0, 0], sizes = [4, 160], strides = [1, 1]} : vector<4x192xf32> to vector<4x160xf32>
    %7 = vector.extract_strided_slice %5 {offsets = [0, 16], sizes = [4, 160], strides = [1, 1]} : vector<4x192xf32> to vector<4x160xf32>
    %8 = vector.extract_strided_slice %5 {offsets = [0, 32], sizes = [4, 160], strides = [1, 1]} : vector<4x192xf32> to vector<4x160xf32>
    %9 = tpu.concatenate %6, %7, %8 in 0 : vector<4x160xf32>, vector<4x160xf32>, vector<4x160xf32> -> vector<12x160xf32>
    %cst = arith.constant dense<0.000000e+00> : vector<16x160xf32>
    %10 = tpu.matmul %0, %9, %cst {dimension_numbers = #tpu.dot_dimension_numbers<[1], [0], [0], [1], [0, 0, 1, 1], [], []>} : vector<16x12xf32>, vector<12x160xf32>, vector<16x160xf32> -> vector<16x160xf32>
    %11 = arith.addf %10, %3 : vector<16x160xf32>
    %12 = vector.extract_strided_slice %11 {offsets = [0, 0], sizes = [8, 160], strides = [1, 1]} : vector<16x160xf32> to vector<8x160xf32>
    %13 = vector.extract_strided_slice %11 {offsets = [8, 0], sizes = [8, 160], strides = [1, 1]} : vector<16x160xf32> to vector<8x160xf32>
    %14 = arith.negf %13 : vector<8x160xf32>
    %15 = math.exp %14 : vector<8x160xf32>
    %cst_6 = arith.constant 1.000000e+00 : f32
    %16 = vector.broadcast %cst_6 : f32 to vector<8x160xf32>
    %17 = arith.addf %16, %15 : vector<8x160xf32>
    %18 = arith.divf %16, %17 : vector<8x160xf32>
    %19 = arith.mulf %12, %18 : vector<8x160xf32>
    %c0_7 = arith.constant 0 : index
    %c0_8 = arith.constant 0 : index
    %c0_9 = arith.constant 0 : index
    %20 = vector.load %arg4[%c0_7, %c0_8, %c0_9] : memref<1x8x160xf32, #tpu.memory_space<vmem>>, vector<1x8x160xf32>
    %21 = vector.shape_cast %20 : vector<1x8x160xf32> to vector<8x160xf32>
    %22 = vector.shape_cast %19 : vector<8x160xf32> to vector<1x8x160xf32>
    tpu.vector_store %arg4[%c0_7, %c0_8, %c0_9], %22 {strides = array<i32>} : memref<1x8x160xf32, #tpu.memory_space<vmem>>, vector<1x8x160xf32>,
    return
  }
  func.func @transform_0(%arg0: i32) -> (i32, i32, i32) {
    %c0_i32 = arith.constant 0 : i32
    %c0_i32_0 = arith.constant 0 : i32
    %c0_i32_1 = arith.constant 0 : i32
    return %arg0, %c0_i32, %c0_i32_0 : i32, i32, i32
  }
  func.func @transform_1(%arg0: i32) -> (i32, i32) {
    %c0_i32 = arith.constant 0 : i32
    %c0_i32_0 = arith.constant 0 : i32
    %c0_i32_1 = arith.constant 0 : i32
    return %c0_i32, %c0_i32_0 : i32, i32
  }
  func.func @transform_2(%arg0: i32) -> (i32, i32) {
    %c0_i32 = arith.constant 0 : i32
    %c0_i32_0 = arith.constant 0 : i32
    %c0_i32_1 = arith.constant 0 : i32
    return %c0_i32, %c0_i32_0 : i32, i32
  }
  func.func @transform_3(%arg0: i32) -> (i32, i32, i32) {
    %c0_i32 = arith.constant 0 : i32
    %c0_i32_0 = arith.constant 0 : i32
    %c0_i32_1 = arith.constant 0 : i32
    return %arg0, %c0_i32, %c0_i32_0 : i32, i32, i32
  }
}

</mosaic_0001>

<bundles_post_ra>
// kernel: tpu_custom_call.1
= control target key start
LH: loop header
LB: loop body
LE: loop exit
PB: predicated region body
PF: predicated region fallthrough
CT: control target
= control target key end

     0   :  { %8 = vsyncpa [#allocation3], 0  ;;  %s742_s0 = inlined_call_operand.vmem [shape: f32[2,4,192], index: 0, kind: input, shape index: {}]   ;;  %s743_s1 = inlined_call_operand.hbm [shape: f32[16,12], index: 1, kind: input, shape index: {}]   ;;  %s744_s2 = inlined_call_operand.vmem [shape: f32[16,1], index: 2, kind: input, shape index: {}]   ;;  %s745_s3 = inlined_call_operand.hbm [shape: f32[2,8,160], index: 3, kind: output, shape index: {}]  }
   0x1   :  { %9 = vsyncpa [#allocation4], 0 }
   0x2   :  { %11 = vsyncpa [#allocation4 + $0x1], 0  ;;  %s625_s12 = smov 0   ;;  %s627_s13 = smov 0  }
   0x3   :  { %s629_s14 = smov 0   ;;  %s631_s15 = smov 0  }
   0x4 LB: > { %s646_s16 = sadd.s32 4294967295, %s595_s15   ;;  %s411_s17 = sadd.s32 4294967294, %s595_s15   ;;  %s595_s15 = sphi %s631_s15, %s753_s15   ;;  %s591_s14 = sphi %s629_s14, %s752_s14   ;;  %s587_s13 = sphi %s627_s13, %s751_s13   ;;  %s583_s12 = sphi %s625_s12, %s750_s12  }
   0x5   : > { %s650_s18 = sadd.s32 1, %s595_s15   ;;  %s92_s19 = sadd.s32 1, %s591_s14 }
   0x6   : > { %s89_s20 = ssub.s32 %s595_s15, %s650_s18  ;;  %p102_p0 = scmp.ne.s32.totalorder %s591_s14, %s587_s13 }
   0x7   : > { %p90_p1 = scmp.eq.s32.totalorder %s89_s20, 0  ;;  %p103_p2 = scmp.eq.s32.totalorder %s646_s16, 1 }
   0x8   : > { %p108_p3 = scmp.ne.s32.totalorder %s587_s13, %s583_s12  ;;  %p109_p4 = scmp.eq.s32.totalorder %s411_s17, 1 }
   0x9   : > { %s661_s21 = scalar_select %p90_p1, %s591_s14, %s92_s19  }
   0xa   : > { %p663_p5 = por %p103_p2, %p102_p0  ;;  %p667_p6 = por %p109_p4, %p108_p3 }
   0xb   : > { %p412_p7 = scmp.ge.s32.totalorder %s595_s15, 1  ;;  %p116_p8 = scmp.lt.s32.totalorder %s595_s15, 3 }
   0xc   : > { %s747_s23 = scalar_select %p667_p6, 1, 0 }
   0xd   : > { %p451_p9 = scmp.eq.s32.totalorder %s646_s16, 0  ;;  %p674_p10 = pnand %p412_p7, %p116_p8 }
   0xe   : > { %s597_s25 = smov [#allocation2]  }
   0xf   : > { %s128_s26 = sshll.u32 %s597_s25, 4  ;;  %p443_p11 = pneg %p674_p10  ;;  %s129_s26 = int_to_ptr.vmem [resolvable:$true] %s128_s26 }
  0x10   : > { %s516_s27 = scalar_lea.vmem %s129_s26, 256  ;;  %p524_p3 = scmp.lt.s32.totalorder %s129_s26, %s129_s26 }
  0x11   : > { %p444_p12 = pnand %p451_p9, %p443_p11  ;;  %p517_p0 = scmp.ne.s32.totalorder %s129_s26, %s516_s27 }
  0x12   : > { %p525_p4 = scmp.lt.s32.totalorder %s516_s27, %s516_s27 }
  0x13   : > { %p507_p13 = pneg %p444_p12 }
  0x14   : > { %p526_p6 = por %p525_p4, %p524_p3 }
  0x15   : > { %p519_p1 = pnand %p517_p0, %p507_p13 }
  0x17   : > { %p520_p2 = pneg %p519_p1 }
  0x19   : > { %p527_p7 = pnand %p526_p6, %p520_p2 }
  0x1b   : > { %530 = shalt.err (!%p527_p7)
}
  0x1c   : > { %s598_s28 = smov 128   ;;  %s599_s29 = smov 8  }
  0x1d   : > { %446 = dma.hbm_to_vmem [thread:$0]  (!%p444_p12), %s743_s1, 256, %s129_s26, [#allocation3], %s598_s28, %s598_s28, %s599_s29  }
  0x1e   : > { %155 = sbr.rel (%p674_p10) target bundleno = 411 (0x19b), region = 32 }
  0x23   : > { %574 = dma.done.wait (%p451_p9), [#allocation3], 256  }
  0x24   : > { %576 = vsyncadd (%p451_p9), [#allocation3], 4294967040  ;;  %p179_p8 = scmp.lt.s32.totalorder %s646_s16, 1  ;;  %v600_v0 = vmov 0.0   ;;  %v601_v1 = vmov 0   ;;  %s602_s10 = smov 96  }
  0x25   : > { %301 = vmatprep.mubr.f32.mxu1 %v600_v0  ;;  %295 = vmatprep.mubr.f32.mxu0 %v600_v0  ;;  %s603_s11 = smov 112   ;;  %v187_v5 = vld [vmem:[%s744_s2 + $0x8] sm:$0xff]  ;;  %v186_v6 = vld [vmem:[%s744_s2] sm:$0xff]  ;;  %vm217_vm0 = vcmask 1043456   ;;  %vm215_vm1 = vcmask 785408   ;;  %vm207_vm2 = vcmask 916480  }
  0x26   : > { %s180_s5 = scalar_select %p179_p8, %s646_s16, 1  ;;  %493 = vset.pattern.permute.xlu0 %v601_v1  ;;  %494 = vset.pattern.permute.xlu1 %v601_v1  ;;  %v185_v14 = vld [vmem:[#allocation2 + $0x8] sm:$0xff]  ;;  %vm220_vm3 = vcmask 97280   ;;  %v184_v15 = vld [vmem:[#allocation2] sm:$0xff]  ;;  %vm323_vm4 = vcmask 261120  }
  0x27   : > { %s176_s25 = sand.u32 1, %s587_s13   ;;  %s432_s27 = sshll.u32 %s646_s16, 8 }
  0x28   : > { %s431_s6 = sshll.u32 %s180_s5, 3  ;;  %s417_s26 = sshll.u32 %s176_s25, 4 }
  0x29   : > { %s183_s9 = scalar_lea.vmem %s742_s0, %s431_s6  ;;  %s178_s28 = scalar_lea.vmem [#allocation5], %s417_s26 }
  0x2a   : > { %v198_v2 = vld [vmem:[%s183_s9] sm:$0xff]  ;;  %s340_s29 = sshll.u32 %s178_s28, 4  ;;  %s338_s5 = scalar_lea.hbm %s745_s3, %s432_s27  ;;  %s341_s29 = int_to_ptr.vmem [resolvable:$true] %s340_s29 }
  0x2b   : > { %211 = vrot.lane.b32.xlu0 %v198_v2, %s602_s10  ;;  %v202_v3 = vcombine.low %v198_v2, %v198_v2  ;;  %v200_v4 = vcombine.high %v198_v2, %v198_v2  ;;  %s326_s6 = scalar_lea.sflag [#allocation4], %s176_s25  ;;  %s531_s7 = scalar_lea.vmem %s341_s29, 256 }
  0x2c   : > { %p532_p6 = scmp.ne.s32.totalorder %s341_s29, %s531_s7  ;;  %s604_s16 = smov [#allocation5]  }
  0x2d   : > { %203 = vrot.lane.b32.xlu1 %v202_v3, %s603_s11  ;;  %s535_s8 = sshll.u32 %s604_s16, 4  ;;  %s536_s8 = int_to_ptr.vmem [resolvable:$false] %s535_s8 }
  0x2e   : > { %p533_p9 = pnand %p532_p6, %p663_p5  ;;  %s537_s9 = scalar_lea.vmem %s536_s8, 512 }
  0x2f   : > { %213 = vrot.lane.b32.xlu0 %v200_v4, %s602_s10  ;;  %p538_p11 = scmp.lt.s32.totalorder %s341_s29, %s536_s8  ;;  %p539_p12 = scmp.lt.s32.totalorder %s537_s9, %s531_s7 }
  0x30   : > { %p534_p10 = pneg %p533_p9 }
  0x31   : > { %205 = vrot.lane.b32.xlu1 %v198_v2, %s603_s11  ;;  %p540_p13 = por %p539_p12, %p538_p11 }
  0x33   : > { %195 = vperm.xlu0 %493, %v187_v5   ;;  %p541_p0 = pnand %p540_p13, %p534_p10 }
  0x35   : > { %190 = vperm.xlu1 %494, %v186_v6  }
  0x9d   : > { %v212_v7 = vpop.permute.xlu0 %211 }
  0x9f   : > { %v204_v8 = vpop.permute.xlu1 %203 }
  0xa1   : > { %v214_v9 = vpop.permute.xlu0 %213 }
  0xa2   : > { %420 = vmatprep.subr.msk.mxu0 %vm217_vm0, %v214_v9  ;;  %433 = vmatprep.subr.msk.mxu1 %vm217_vm0, %v214_v9  ;;  %v216_v10 = vsel %vm215_vm1, %v212_v7, %v214_v9 }
  0xa3   : > { %v206_v11 = vpop.permute.xlu1 %205  ;;  %421 = vmatpush1.msk.msra.mxu0 %vm217_vm0, %v216_v10  ;;  %435 = vmatpush1.msk.msra.mxu1 %vm217_vm0, %v216_v10 }
  0xa4   : > { %v208_v12 = vsel %vm207_vm2, %v204_v8, %v206_v11  ;;  %v219_v13 = vsel %vm217_vm0, %v200_v4, %v206_v11 }
  0xa5   : > { %261 = vmatprep.subr.mxu0 %v219_v13  ;;  %434 = vmatprep.subr.mxu1 %v219_v13  ;;  %v218_v16 = vsel %vm217_vm0, %v198_v2, %v208_v12 }
  0xa6   : > { %262 = vmatpush1.msra.mxu0 %v218_v16  ;;  %436 = vmatpush1.msra.mxu1 %v218_v16 }
  0xa7   : > { %423 = vmatmul.mubr.msk.f32.vlgmr.msra.gmra.mxu1 %vm220_vm3, %v185_v14  ;;  %422 = vmatmul.mubr.msk.f32.vlgmr.msra.gmra.mxu0 %vm220_vm3, %v184_v15 }
  0xae   : > { %v196_v17 = vpop.permute.xlu0 %195 }
  0xb0   : > { %v191_v29 = vpop.permute.xlu1 %190 }
 0x167   : > { %v303_v18 = vpop.f32.mrf.mxu1  ;;  %v297_v28 = vpop.f32.mrf.mxu0 }
 0x168   : > { %v304_v19 = vadd.f32 %v303_v18, %v196_v17  ;;  %v298_v30 = vadd.f32 %v297_v28, %v191_v29 }
 0x169   : > { %v305_v20 = vpop.f32.mrf.mxu1  ;;  %v299_v31 = vpop.f32.mrf.mxu0 }
 0x16a   : > { %v424_v21 = vmul.f32 -1.442695, %v304_v19  ;;  %v306_v22 = vadd.f32 %v305_v20, %v196_v17  ;;  %v300_v34 = vadd.f32 %v299_v31, %v191_v29 }
 0x16c   : > { %497 = vpow2.f32 %v424_v21  ;;  %v425_v23 = vmul.f32 -1.442695, %v306_v22 }
 0x16e   : > { %499 = vpow2.f32 %v425_v23 }
 0x179   : > { %v498_v24 = vpop.eup %497 }
 0x17a   : > { %v314_v25 = vadd.f32 1.0, %v498_v24 }
 0x17b   : > { %v500_v26 = vpop.eup %499 }
 0x17c   : > { %501 = vrcp.f32 %v314_v25  ;;  %v315_v27 = vadd.f32 1.0, %v500_v26 }
 0x17e   : > { %503 = vrcp.f32 %v315_v27 }
 0x189   : > { %v502_v32 = vpop.eup %501 }
 0x18a   : > { %v320_v33 = vmul.f32 %v502_v32, %v298_v30 }
 0x18b   : > { %v504_v35 = vpop.eup %503 }
 0x18c   : > { %322 = vst [vmem:[%s178_s28] sm:$0xff] %v320_v33  ;;  %v321_v36 = vmul.f32 %v504_v35, %v300_v34 }
 0x18e   : > { %324 = vst.msk [vmem:[%s178_s28 + $0x8] sm:$0xff] %vm323_vm4, %v321_v36 }
 0x18f   : > { %544 = shalt.err (!%p541_p0)
}
 0x190   : > { %s545_s10 = scalar_lea.hbm %s338_s5, 256  ;;  %s549_s19 = scalar_lea.hbm %s745_s3, 512 }
 0x191   : > { %p546_p1 = scmp.ne.s32.totalorder %s338_s5, %s545_s10  ;;  %p550_p4 = scmp.lt.s32.totalorder %s338_s5, %s745_s3 }
 0x192   : > { %p551_p7 = scmp.lt.s32.totalorder %s549_s19, %s545_s10 }
 0x193   : > { %p547_p2 = pnand %p546_p1, %p663_p5 }
 0x194   : > { %p552_p8 = por %p551_p7, %p550_p4 }
 0x195   : > { %p548_p3 = pneg %p547_p2 }
 0x197   : > { %p553_p6 = pnand %p552_p8, %p548_p3 }
 0x199   : > { %556 = shalt.err (!%p553_p6)
}
 0x19a   : > { %441 = dma.vmem_to_hbm [thread:$0]  (%p663_p5), %s341_s29, 256, %s338_s5, %s326_s6  }
 0x19b PF: > { %p453_p9 = scmp.ge.s32.totalorder %s595_s15, 2  ;;  %s352_s25 = sand.u32 1, %s583_s12  }
 0x19c   : > { %p749_p10 = scmp.ne.s32.totalorder %s747_s23, 0  ;;  %s353_s26 = scalar_lea.sflag [#allocation4], %s352_s25 }
 0x19e   : > { %p448_p11 = pnand %p453_p9, %p749_p10 }
 0x1a0   : > { %p449_p12 = pneg %p448_p11 }
 0x1a2   : > { %578 = dma.done.wait (%p449_p12), %s353_s26, 256  }
 0x1a3   : > { %580 = vsyncadd (%p449_p12), %s353_s26, 4294967040  ;;  %p14_p13 = scmp.ge.s32.totalorder %s650_s18, 4   ;;  %s750_s12 = smov %s587_s13 }
 0x1a4   : > { %s751_s13 = smov %s591_s14  ;;  %s752_s14 = smov %s661_s21 }
 0x1a5   : > { %s753_s15 = smov %s650_s18  ;;  %16 = sbr.rel (!%p14_p13) target bundleno = 4 (0x4), region = 72 }
 0x1aa   :  { %358 = vsyncpa [#allocation3], 1 }
 0x1ab   :  { %360 = vsyncpa [#allocation3 + $0x1], 1 }
 0x1ac   :  { %361 = vsyncpa [#allocation4], 1 }
 0x1ad   :  { %363 = vsyncpa [#allocation4 + $0x1], 1 }

</bundles_post_ra>
